<compile_context>
chip_gen: v7x
topology: tpu7x:2x2x1
jax: 0.10.0
libtpu: 0.0.40
codegen_flags: <defaults>
</compile_context>

<pallas_src>
import functools

import jax
import jax.numpy as jnp
from jax.experimental import pallas as pl
from jax.experimental.pallas import tpu as pltpu


def _round_up(n, m):
    return ((n + m - 1) // m) * m


def _pick_batch_tile(batch, requested):
    """Batch tile: multiple of 8 (f32 sublane granularity), no larger than the
    (rounded-up) batch, no larger than requested. No forced multi-step split:
    on single-TC chips an extra grid step is pure overhead; at large batches
    the requested tile naturally yields multiple steps for v7x megacore."""
    g = 8
    requested = max(g, _round_up(requested, g))
    full = _round_up(batch, g)
    return min(requested, full)


def _mlp_softmax_kernel(x_ref, w1_ref, b1_ref, w2_ref, b2_ref, w3_ref, b3_ref,
                        o_ref):
    # bf16 MXU operands, f32 accumulation; all casts are in-kernel (VPU slack).
    x = x_ref[...].astype(jnp.bfloat16)
    w1 = w1_ref[...].astype(jnp.bfloat16)
    w2 = w2_ref[...].astype(jnp.bfloat16)
    w3 = w3_ref[...].astype(jnp.bfloat16)

    # Load biases once (f32 adds after f32 accumulation).
    b1 = b1_ref[...]
    b2 = b2_ref[...]
    b3 = b3_ref[...]

    # fc1 + relu
    h1 = jnp.dot(x, w1, preferred_element_type=jnp.float32)
    h1 = jnp.maximum(h1 + b1, 0.0)

    # fc2 + relu  (dropout == identity in eval mode)
    h2 = jnp.dot(h1.astype(jnp.bfloat16), w2, preferred_element_type=jnp.float32)
    h2 = jnp.maximum(h2 + b2, 0.0)

    # fc3 logits (full, unpadded classifier width)
    logits = jnp.dot(h2.astype(jnp.bfloat16), w3,
                     preferred_element_type=jnp.float32)
    logits = logits + b3

    # softmax along dim=1 (feature axis)
    m = jnp.max(logits, axis=1, keepdims=True)
    e = jnp.exp(logits - m)
    denom = jnp.sum(e, axis=1, keepdims=True)
    inv = pl.reciprocal(denom, approx=True)        # EUP slot, ~free
    o_ref[...] = (e * inv).astype(o_ref.dtype)


@functools.partial(jax.jit, static_argnames=("batch_tile",))
def classifier_net_fc3(x, w1, b1, w2, b2, w3, b3, *, batch_tile=2048):
    B, in_dim = x.shape
    out_dim = w3.shape[1]

    # ---- batch tiling (pad only when needed) ----
    bt = _pick_batch_tile(B, batch_tile)
    Bp = _round_up(B, bt)
    xp = x if Bp == B else jnp.pad(x, ((0, Bp - B), (0, 0)))

    grid = (Bp // bt,)

    in_specs = [
        pl.BlockSpec((bt, in_dim), lambda i: (i, 0)),     # x tile (f32)
        pl.BlockSpec(w1.shape, lambda i: (0, 0)),         # w1 (resident)
        pl.BlockSpec(b1.shape, lambda i: (0, 0)),         # b1
        pl.BlockSpec(w2.shape, lambda i: (0, 0)),         # w2
        pl.BlockSpec(b2.shape, lambda i: (0, 0)),         # b2
        pl.BlockSpec(w3.shape, lambda i: (0, 0)),         # w3
        pl.BlockSpec(b3.shape, lambda i: (0, 0)),         # b3
    ]
    # Block spans the full (unpadded) classifier width -> contiguous HBM store.
    out_spec = pl.BlockSpec((bt, out_dim), lambda i: (i, 0))

    out = pl.pallas_call(
        _mlp_softmax_kernel,
        out_shape=jax.ShapeDtypeStruct((Bp, out_dim), jnp.float32),
        grid_spec=pltpu.PrefetchScalarGridSpec(
            num_scalar_prefetch=0,
            grid=grid,
            in_specs=in_specs,
            out_specs=out_spec,
        ),
        compiler_params=pltpu.CompilerParams(
            dimension_semantics=("parallel",),
            vmem_limit_bytes=32 * 1024 * 1024,
        ),
    )(xp, w1, b1, w2, b2, w3, b3)

    if Bp != B:
        out = out[:B]
    return out


def init_params(key, input_dim, output_dim):
    """Deterministic init mimicking PyTorch nn.Linear (uniform +-1/sqrt(fan_in)).
    Weights are returned as (in_dim, out_dim) = PyTorch weight transposed."""
    dims = [(input_dim, 64), (64, 32), (32, output_dim)]
    params = []
    for (fan_in, fan_out) in dims:
        key, kw, kb = jax.random.split(key, 3)
        bound = 1.0 / (fan_in ** 0.5)
        w = jax.random.uniform(kw, (fan_in, fan_out), jnp.float32,
                               minval=-bound, maxval=bound)
        b = jax.random.uniform(kb, (1, fan_out), jnp.float32,
                               minval=-bound, maxval=bound)
        params += [w, b]
    return params


if __name__ == "__main__":
    batch = 8
    input_dim = 32
    output_dim = 10

    key = jax.random.PRNGKey(0)
    key, kx = jax.random.split(key)
    x = jax.random.normal(kx, (batch, input_dim), jnp.float32)

    w1, b1, w2, b2, w3, b3 = init_params(key, input_dim, output_dim)

    out = classifier_net_fc3(x, w1, b1, w2, b2, w3, b3)
    out = jax.block_until_ready(out)

    assert out.shape == (batch, output_dim)

    # sanity: softmax rows sum to 1 (approx reciprocal -> loose tolerance)
    row_sums = jnp.sum(out, axis=1)
    assert bool(jnp.allclose(row_sums, jnp.ones_like(row_sums), atol=1e-2))

    # pure-JAX f32 reference (eval-mode dropout = identity); bf16 tolerance
    h = jnp.maximum(x @ w1 + b1, 0.0)
    h = jnp.maximum(h @ w2 + b2, 0.0)
    ref = jax.nn.softmax(h @ w3 + b3, axis=1)
    assert bool(jnp.allclose(out, ref, atol=2e-2))

    print("KERNEL_OK")
</pallas_src>

<mosaic_0001>
module attributes {stable_mosaic.version = 11 : i64} {
  func.func @_mlp_softmax_kernel(%arg0: i32, %arg1: memref<8x32xf32, #tpu.memory_space<vmem>>, %arg2: memref<32x64xf32, #tpu.memory_space<vmem>>, %arg3: memref<1x64xf32, #tpu.memory_space<vmem>>, %arg4: memref<64x32xf32, #tpu.memory_space<vmem>>, %arg5: memref<1x32xf32, #tpu.memory_space<vmem>>, %arg6: memref<32x10xf32, #tpu.memory_space<vmem>>, %arg7: memref<1x10xf32, #tpu.memory_space<vmem>>, %arg8: memref<8x10xf32, #tpu.memory_space<vmem>>) attributes {dimension_semantics = [#tpu.dimension_semantics<parallel>], iteration_bounds = array<i64: 1>, scalar_prefetch = 0 : i64, scratch_operands = 0 : i64, tpu.core_type = #tpu.core_type<tc>, window_params = [{transform_indices = @transform_0, window_bounds = array<i64: 8, 32>}, {pipeline_mode = #tpu.pipeline_mode<synchronous>, transform_indices = @transform_1, window_bounds = array<i64: 32, 64>}, {pipeline_mode = #tpu.pipeline_mode<synchronous>, transform_indices = @transform_2, window_bounds = array<i64: 1, 64>}, {pipeline_mode = #tpu.pipeline_mode<synchronous>, transform_indices = @transform_3, window_bounds = array<i64: 64, 32>}, {pipeline_mode = #tpu.pipeline_mode<synchronous>, transform_indices = @transform_4, window_bounds = array<i64: 1, 32>}, {pipeline_mode = #tpu.pipeline_mode<synchronous>, transform_indices = @transform_5, window_bounds = array<i64: 32, 10>}, {pipeline_mode = #tpu.pipeline_mode<synchronous>, transform_indices = @transform_6, window_bounds = array<i64: 1, 10>}, {transform_indices = @transform_7, window_bounds = array<i64: 8, 10>}]} {
    %c0 = arith.constant 0 : index
    %c0_0 = arith.constant 0 : index
    %0 = vector.load %arg1[%c0, %c0_0] : memref<8x32xf32, #tpu.memory_space<vmem>>, vector<8x32xf32>
    %1 = arith.truncf %0 : vector<8x32xf32> to vector<8x32xbf16>
    %c0_1 = arith.constant 0 : index
    %c0_2 = arith.constant 0 : index
    %2 = vector.load %arg2[%c0_1, %c0_2] : memref<32x64xf32, #tpu.memory_space<vmem>>, vector<32x64xf32>
    %3 = arith.truncf %2 : vector<32x64xf32> to vector<32x64xbf16>
    %c0_3 = arith.constant 0 : index
    %c0_4 = arith.constant 0 : index
    %4 = vector.load %arg4[%c0_3, %c0_4] : memref<64x32xf32, #tpu.memory_space<vmem>>, vector<64x32xf32>
    %5 = arith.truncf %4 : vector<64x32xf32> to vector<64x32xbf16>
    %c0_5 = arith.constant 0 : index
    %c0_6 = arith.constant 0 : index
    %6 = vector.load %arg6[%c0_5, %c0_6] : memref<32x10xf32, #tpu.memory_space<vmem>>, vector<32x10xf32>
    %7 = arith.truncf %6 : vector<32x10xf32> to vector<32x10xbf16>
    %c0_7 = arith.constant 0 : index
    %c0_8 = arith.constant 0 : index
    %8 = vector.load %arg3[%c0_7, %c0_8] : memref<1x64xf32, #tpu.memory_space<vmem>>, vector<1x64xf32>
    %c0_9 = arith.constant 0 : index
    %c0_10 = arith.constant 0 : index
    %9 = vector.load %arg5[%c0_9, %c0_10] : memref<1x32xf32, #tpu.memory_space<vmem>>, vector<1x32xf32>
    %c0_11 = arith.constant 0 : index
    %c0_12 = arith.constant 0 : index
    %10 = vector.load %arg7[%c0_11, %c0_12] : memref<1x10xf32, #tpu.memory_space<vmem>>, vector<1x10xf32>
    %cst = arith.constant dense<0.000000e+00> : vector<8x64xf32>
    %11 = tpu.matmul %1, %3, %cst {dimension_numbers = #tpu.dot_dimension_numbers<[1], [0], [0], [1], [0, 0, 1, 1], [], []>} : vector<8x32xbf16>, vector<32x64xbf16>, vector<8x64xf32> -> vector<8x64xf32>
    %12 = vector.broadcast %8 : vector<1x64xf32> to vector<8x64xf32>
    %13 = arith.addf %11, %12 : vector<8x64xf32>
    %cst_13 = arith.constant 0.000000e+00 : f32
    %14 = vector.broadcast %cst_13 : f32 to vector<8x64xf32>
    %15 = arith.maximumf %13, %14 : vector<8x64xf32>
    %16 = arith.truncf %15 : vector<8x64xf32> to vector<8x64xbf16>
    %cst_14 = arith.constant dense<0.000000e+00> : vector<8x32xf32>
    %17 = tpu.matmul %16, %5, %cst_14 {dimension_numbers = #tpu.dot_dimension_numbers<[1], [0], [0], [1], [0, 0, 1, 1], [], []>} : vector<8x64xbf16>, vector<64x32xbf16>, vector<8x32xf32> -> vector<8x32xf32>
    %18 = vector.broadcast %9 : vector<1x32xf32> to vector<8x32xf32>
    %19 = arith.addf %17, %18 : vector<8x32xf32>
    %cst_15 = arith.constant 0.000000e+00 : f32
    %20 = vector.broadcast %cst_15 : f32 to vector<8x32xf32>
    %21 = arith.maximumf %19, %20 : vector<8x32xf32>
    %22 = arith.truncf %21 : vector<8x32xf32> to vector<8x32xbf16>
    %cst_16 = arith.constant dense<0.000000e+00> : vector<8x10xf32>
    %23 = tpu.matmul %22, %7, %cst_16 {dimension_numbers = #tpu.dot_dimension_numbers<[1], [0], [0], [1], [0, 0, 1, 1], [], []>} : vector<8x32xbf16>, vector<32x10xbf16>, vector<8x10xf32> -> vector<8x10xf32>
    %24 = vector.broadcast %10 : vector<1x10xf32> to vector<8x10xf32>
    %25 = arith.addf %23, %24 : vector<8x10xf32>
    %cst_17 = arith.constant dense<0xFF800000> : vector<8xf32>
    %26 = vector.multi_reduction <maximumf>, %25, %cst_17 [1] : vector<8x10xf32> to vector<8xf32>
    %27 = vector.shape_cast %26 : vector<8xf32> to vector<8x1xf32>
    %28 = vector.broadcast %27 : vector<8x1xf32> to vector<8x10xf32>
    %29 = arith.subf %25, %28 : vector<8x10xf32>
    %30 = math.exp %29 : vector<8x10xf32>
    %cst_18 = arith.constant dense<0.000000e+00> : vector<8xf32>
    %31 = vector.multi_reduction <add>, %30, %cst_18 [1] : vector<8x10xf32> to vector<8xf32>
    %32 = vector.shape_cast %31 : vector<8xf32> to vector<8x1xf32>
    %33 = tpu.reciprocal %32 {approx = true} : vector<8x1xf32> -> vector<8x1xf32>
    %34 = vector.broadcast %33 : vector<8x1xf32> to vector<8x10xf32>
    %35 = arith.mulf %30, %34 : vector<8x10xf32>
    %c0_19 = arith.constant 0 : index
    %c0_20 = arith.constant 0 : index
    %36 = vector.load %arg8[%c0_19, %c0_20] : memref<8x10xf32, #tpu.memory_space<vmem>>, vector<8x10xf32>
    tpu.vector_store %arg8[%c0_19, %c0_20], %35 {strides = array<i32>} : memref<8x10xf32, #tpu.memory_space<vmem>>, vector<8x10xf32>,
    return
  }
  func.func @transform_0(%arg0: i32) -> (i32, i32) {
    %c0_i32 = arith.constant 0 : i32
    %c0_i32_0 = arith.constant 0 : i32
    return %arg0, %c0_i32 : i32, i32
  }
  func.func @transform_1(%arg0: i32) -> (i32, i32) {
    %c0_i32 = arith.constant 0 : i32
    %c0_i32_0 = arith.constant 0 : i32
    %c0_i32_1 = arith.constant 0 : i32
    return %c0_i32, %c0_i32_0 : i32, i32
  }
  func.func @transform_2(%arg0: i32) -> (i32, i32) {
    %c0_i32 = arith.constant 0 : i32
    %c0_i32_0 = arith.constant 0 : i32
    %c0_i32_1 = arith.constant 0 : i32
    return %c0_i32, %c0_i32_0 : i32, i32
  }
  func.func @transform_3(%arg0: i32) -> (i32, i32) {
    %c0_i32 = arith.constant 0 : i32
    %c0_i32_0 = arith.constant 0 : i32
    %c0_i32_1 = arith.constant 0 : i32
    return %c0_i32, %c0_i32_0 : i32, i32
  }
  func.func @transform_4(%arg0: i32) -> (i32, i32) {
    %c0_i32 = arith.constant 0 : i32
    %c0_i32_0 = arith.constant 0 : i32
    %c0_i32_1 = arith.constant 0 : i32
    return %c0_i32, %c0_i32_0 : i32, i32
  }
  func.func @transform_5(%arg0: i32) -> (i32, i32) {
    %c0_i32 = arith.constant 0 : i32
    %c0_i32_0 = arith.constant 0 : i32
    %c0_i32_1 = arith.constant 0 : i32
    return %c0_i32, %c0_i32_0 : i32, i32
  }
  func.func @transform_6(%arg0: i32) -> (i32, i32) {
    %c0_i32 = arith.constant 0 : i32
    %c0_i32_0 = arith.constant 0 : i32
    %c0_i32_1 = arith.constant 0 : i32
    return %c0_i32, %c0_i32_0 : i32, i32
  }
  func.func @transform_7(%arg0: i32) -> (i32, i32) {
    %c0_i32 = arith.constant 0 : i32
    %c0_i32_0 = arith.constant 0 : i32
    return %arg0, %c0_i32 : i32, i32
  }
}

</mosaic_0001>

<bundles_post_ra>
// kernel: classifier_net_fc3.1
= control target key start
LH: loop header
LB: loop body
LE: loop exit
PB: predicated region body
PF: predicated region fallthrough
CT: control target
= control target key end

     0   :  { %v313_v3 = vmov 0.0   ;;  %vm314_vm0 = vmmov 0   ;;  %s436_s0 = inlined_call_operand.vmem [shape: f32[8,32], index: 0, kind: input, shape index: {}]   ;;  %s437_s1 = inlined_call_operand.vmem [shape: f32[32,64], index: 1, kind: input, shape index: {}]   ;;  %s438_s2 = inlined_call_operand.vmem [shape: f32[1,64], index: 2, kind: input, shape index: {}]   ;;  %s439_s3 = inlined_call_operand.vmem [shape: f32[64,32], index: 3, kind: input, shape index: {}]   ;;  %s440_s4 = inlined_call_operand.vmem [shape: f32[1,32], index: 4, kind: input, shape index: {}]   ;;  %s441_s5 = inlined_call_operand.vmem [shape: f32[32,10], index: 5, kind: input, shape index: {}]   ;;  %s442_s6 = inlined_call_operand.vmem [shape: f32[1,10], index: 6, kind: input, shape index: {}]   ;;  %s443_s7 = inlined_call_operand.hbm [shape: f32[8,10], index: 7, kind: output, shape index: {}]  }
   0x1   :  { %v30_v0 = vld [vmem:[%s437_s1] sm:$0xff]  ;;  %v31_v1 = vld [vmem:[%s437_s1 + $0x8] sm:$0xff]  ;;  %v32_v2 = vld [vmem:[%s437_s1 + $0x10] sm:$0xff]  ;;  %254 = vmatprep.subr.bf16.mxu0 %v313_v3  ;;  %258 = vmatprep.mubr.msk.bf16.mxu0 %vm314_vm0, %v313_v3 }
   0x2   :  { %v34_v4 = vpack.c.bf16 %v31_v1, %v30_v0  ;;  %v33_v5 = vld [vmem:[%s437_s1 + $0x18] sm:$0xff]  ;;  %v36_v6 = vld [vmem:[%s439_s3] sm:$0xff]  ;;  %262 = vmatprep.subr.bf16.mxu1 %v313_v3  ;;  %v37_v7 = vld [vmem:[%s439_s3 + $0x8] sm:$0xff]  ;;  %270 = vmatprep.mubr.msk.bf16.mxu1 %vm314_vm0, %v313_v3 }
   0x3   :  { %v38_v8 = vld [vmem:[%s439_s3 + $0x10] sm:$0xff]  ;;  %v39_v9 = vld [vmem:[%s439_s3 + $0x18] sm:$0xff]  ;;  %v35_v10 = vpack.c.bf16 %v33_v5, %v32_v2  ;;  %v28_v11 = vld [vmem:[%s436_s0] sm:$0xff]  ;;  %v44_v12 = vpack.c.bf16 %v37_v7, %v36_v6 }
   0x4   :  { %255 = vmatpush3.bf16.msra.mxu0 %v34_v4 }
   0x5   :  { %12 = vsyncpa [#allocation3], 0  ;;  %256 = vmatprep.subr.bf16.mxu0 %v313_v3  ;;  %263 = vmatpush3.bf16.msra.mxu1 %v44_v12  ;;  %v45_v13 = vpack.c.bf16 %v39_v9, %v38_v8  ;;  %v29_v14 = vpack.c.bf16 %v28_v11, %v28_v11  ;;  %vm63_vm1 = vcmask 261120   ;;  %v40_v15 = vld [vmem:[%s439_s3 + $0x20] sm:$0xff]  ;;  %v41_v16 = vld [vmem:[%s439_s3 + $0x28] sm:$0xff]  ;;  %vm115_vm2 = vcmask 523264  }
   0x6   :  { %264 = vmatprep.subr.bf16.mxu1 %v313_v3  ;;  %v46_v17 = vpack.c.bf16 %v41_v16, %v40_v15  ;;  %v42_v18 = vld [vmem:[%s439_s3 + $0x30] sm:$0xff]  ;;  %v43_v19 = vld [vmem:[%s439_s3 + $0x38] sm:$0xff]  ;;  %v48_v21 = vld [vmem:[%s441_s5] sm:$0xff]  ;;  %vm210_vm3 = vcmask 80896  }
   0x7   :  { %v47_v20 = vpack.c.bf16 %v43_v19, %v42_v18  ;;  %v49_v22 = vld [vmem:[%s441_s5 + $0x8] sm:$0xff]  ;;  %v237_v24 = vld [vmem:[%s438_s2] ss:$0 sm:$0xff]  ;;  %v50_v32 = vld [vmem:[%s441_s5 + $0x10] sm:$0xff] }
   0x8   :  { %257 = vmatpush3.bf16.msra.mxu0 %v35_v10  ;;  %v52_v23 = vpack.c.bf16 %v49_v22, %v48_v21  ;;  %v51_v33 = vld [vmem:[%s441_s5 + $0x18] sm:$0xff]  ;;  %v239_v35 = vld [vmem:[%s440_s4] ss:$0 sm:$0xff]  ;;  %s315_s4 = smov [#allocation2]  }
   0x9   :  { %274 = vmatprep.subr.bf16.mxu0 %v313_v3  ;;  %265 = vmatpush3.bf16.msra.mxu1 %v45_v13  ;;  %v53_v34 = vpack.c.bf16 %v51_v33, %v50_v32  ;;  %v241_v43 = vld [vmem:[%s442_s6] ss:$0 sm:$0xff]  ;;  %s229_s5 = sshll.u32 %s315_s4, 4  ;;  %s230_s5 = int_to_ptr.vmem [resolvable:$true] %s229_s5 }
   0xa   :  { %266 = vmatprep.subr.bf16.mxu1 %v313_v3  ;;  %s289_s6 = scalar_lea.vmem %s230_s5, 128  ;;  %p294_p1 = scmp.lt.s32.totalorder %s230_s5, %s230_s5 }
   0xb   :  { %259 = vmatmul.mubr.msk.bf16.vlgmr.msra.gmra.mrb[0].mxu0 %vm63_vm1, %v29_v14  ;;  %p290_p0 = scmp.ne.s32.totalorder %s230_s5, %s289_s6  ;;  %p295_p2 = scmp.lt.s32.totalorder %s289_s6, %s289_s6 }
   0xc   :  { %278 = vmatprep.mubr.msk.bf16.mxu0 %vm314_vm0, %v313_v3  ;;  %275 = vmatpush3.bf16.msra.mxu0 %v52_v23 }
   0xd   :  { %267 = vmatpush3.bf16.msra.mxu1 %v46_v17  ;;  %276 = vmatprep.subr.bf16.mxu0 %v313_v3  ;;  %p296_p3 = por %p295_p2, %p294_p1 }
   0xe   :  { %268 = vmatprep.subr.bf16.mxu1 %v313_v3 }
   0xf   :  { %p297_p4 = pnand %p296_p3, %p290_p0 }
  0x10   :  { %277 = vmatpush3.bf16.msra.mxu0 %v53_v34 }
  0x11   :  { %269 = vmatpush3.bf16.msra.mxu1 %v47_v20 }
  0xde   :  { %v101_v25 = vpop.f32.mrb[0].mxu0 }
  0xdf   :  { %v102_v26 = vadd.f32 %v237_v24, %v101_v25  ;;  %v260_v27 = vpop.f32.mrb[1].mxu0 }
  0xe0   :  { %v104_v28 = vpop.f32.mrb[2].mxu0 }
  0xe1   :  { %v107_v29 = vmax.f32 %v102_v26, 0.0  ;;  %v261_v30 = vpop.f32.mrb[3].mxu0 }
  0xe3   :  { %v108_v31 = vpack.c.bf16 %v107_v29, %v107_v29 }
  0xe5   :  { %271 = vmatmul.mubr.msk.bf16.vlgmr.msra.gmra.mrb[0].mxu1 %vm115_vm2, %v108_v31 }
 0x1b8   :  { %v153_v36 = vpop.f32.mrb[0].mxu1 }
 0x1b9   :  { %v154_v37 = vadd.f32 %v239_v35, %v153_v36  ;;  %v272_v38 = vpop.f32.mrb[1].mxu1 }
 0x1ba   :  { %v156_v39 = vpop.f32.mrb[2].mxu1 }
 0x1bb   :  { %v159_v40 = vmax.f32 %v154_v37, 0.0  ;;  %v273_v41 = vpop.f32.mrb[3].mxu1 }
 0x1bd   :  { %v160_v42 = vpack.c.bf16 %v159_v40, %v159_v40 }
 0x1bf   :  { %279 = vmatmul.mubr.msk.bf16.vlgmr.msra.gmra.mrb[4].mxu0 %vm63_vm1, %v160_v42 }
 0x292   :  { %v204_v44 = vpop.f32.mrb[4].mxu0 }
 0x293   :  { %v205_v45 = vadd.f32 %v241_v43, %v204_v44  ;;  %v280_v46 = vpop.f32.mrb[5].mxu0 }
 0x294   :  { %v207_v47 = vpop.f32.mrb[6].mxu0 }
 0x295   :  { %v281_v48 = vpop.f32.mrb[7].mxu0  ;;  %v211_v49 = vsel %vm210_vm3, %v205_v45, -inf }
 0x296   :  { %212 = vmax.xlane.f32.xlu0 %v211_v49 }
 0x323   :  { %v213_v50 = vpop.xlane.xlu0 %212 }
 0x324   :  { %v214_v51 = vsub.f32 %v205_v45, %v213_v50 }
 0x326   :  { %v215_v52 = vmul.f32 1.442695, %v214_v51 }
 0x328   :  { %285 = vpow2.f32 %v215_v52 }
 0x332   :  { %v286_v53 = vpop.eup %285 }
 0x333   :  { %v217_v54 = vsel %vm210_vm3, %v286_v53, 0.0 }
 0x334   :  { %218 = vadd.xlane.f32.xlu0 %v217_v54 }
 0x3c1   :  { %v219_v55 = vpop.xlane.xlu0 %218 }
 0x3c2   :  { %287 = vrcp.f32 %v219_v55 }
 0x3cc   :  { %v288_v56 = vpop.eup %287 }
 0x3cd   :  { %v221_v57 = vmul.f32 %v288_v56, %v286_v53 }
 0x3cf   :  { %222 = vst.msk [vmem:[#allocation2] sm:$0xff] %vm210_vm3, %v221_v57 }
 0x3d0   :  { %300 = shalt.err (!%p297_p4)
}
 0x3d1   :  { %s301_s16 = scalar_lea.hbm %s443_s7, 128 }
 0x3d2   :  { %p302_p5 = scmp.ne.s32.totalorder %s443_s7, %s301_s16  ;;  %p305_p6 = scmp.lt.u32.totalorder %s301_s16, %s443_s7 }
 0x3d4   :  { %p307_p7 = pnand %p305_p6, %p302_p5 }
 0x3d6   :  { %310 = shalt.err (!%p307_p7)
}
 0x3d7   :  { %232 = dma.vmem_to_hbm [thread:$0]  %s230_s5, 128, %s443_s7, [#allocation3]  }
 0x3d8   :  { %311 = dma.done.wait [#allocation3], 128  }
 0x3d9   :  { %312 = vsyncadd [#allocation3], 4294967168 }
 0x3da   :  { %236 = vsyncpa [#allocation3], 1 }

</bundles_post_ra>
